<compile_context>
chip_gen: v7x
topology: tpu7x:2x2x1
jax: 0.10.0
libtpu: 0.0.40
codegen_flags: <defaults>
</compile_context>

<pallas_src>
import functools

import jax
import jax.numpy as jnp
from jax.experimental import pallas as pl
from jax.experimental.pallas import tpu as pltpu


def _round_up(n: int, m: int) -> int:
    return ((n + m - 1) // m) * m


def _num_tensorcores() -> int:
    """1 TensorCore on v5e/v6e, 2 on v7x-class chips."""
    try:
        kind = (getattr(jax.devices()[0], "device_kind", "") or "").lower()
        if "v7" in kind:
            return 2
    except Exception:  # pragma: no cover - defensive, e.g. no devices yet
        pass
    return 1


def _choose_batch_tiling(B: int, *, sublane: int, num_tc: int, target_tile: int = 512):
    """Grid-first batch tiling.

    * minimal batch padding (pad < sublane * grid rows),
    * grid is a multiple of the TC count on v7x so the "parallel" axis splits
      evenly across both TensorCores,
    * single grid step on 1-TC chips whenever the tile fits the target size.
    Returns (tile_b, grid, B_pad).
    """
    grid = max(1, pl.cdiv(B, target_tile))
    if num_tc > 1 and B >= num_tc * sublane:
        grid = num_tc * pl.cdiv(grid, num_tc)
    tile_b = _round_up(pl.cdiv(B, grid), sublane)
    return tile_b, grid, tile_b * grid


def _make_block_kernel(num_layers: int):
    """Kernel factory for an MLP with `num_layers` Linear layers.

    Ref order: x, (w0, b0, ..., w_{L-1}, b_{L-1}), theta_out
    ReLU after every Linear except the last (which produces theta).
    Matmuls accumulate in f32 on the MXU; bias add / ReLU / store stay in the
    operand dtype (f32 or bf16).
    """

    def kernel(x_ref, *refs):
        param_refs = refs[: 2 * num_layers]
        theta_ref = refs[2 * num_layers]

        cdt = param_refs[0].dtype               # compute (MXU operand) dtype
        h = x_ref[...].astype(cdt)              # cast inside kernel (no extra HBM pass)
        for i in range(num_layers):
            w = param_refs[2 * i][...]          # [in, out_pad] (in unpadded for layer 0)
            b = param_refs[2 * i + 1][...]      # [1, out_pad], cdt
            h = jnp.dot(h, w, preferred_element_type=jnp.float32).astype(cdt) + b
            if i < num_layers - 1:
                h = jnp.maximum(h, 0)           # ReLU in operand dtype

        # Single contiguous, lane-dense theta store (split happens in wrapper).
        theta_ref[...] = h.astype(theta_ref.dtype)

    return kernel


def prepare_block_params(weights, biases, compute_dtype=jnp.float32):
    """Pad parameters to lane-dense (128-multiple) *output* dims ONCE.

    Call at init, not per forward.  The first layer keeps its input dim
    unpadded so x never needs feature padding.

    weights: list of [in, out] f32 (transposed vs. torch Linear.weight)
    biases:  list of [1, out]  f32
    Returns (w_pad tuple, b_pad tuple, true_dims tuple).
    """
    dims = tuple(w.shape[0] for w in weights) + (weights[-1].shape[1],)
    pdims = [dims[0]] + [_round_up(d, 128) for d in dims[1:]]
    w_pad, b_pad = [], []
    for i, (w, b) in enumerate(zip(weights, biases)):
        wp = jnp.zeros((pdims[i], pdims[i + 1]), compute_dtype)
        wp = wp.at[: w.shape[0], : w.shape[1]].set(w.astype(compute_dtype))
        bp = jnp.zeros((1, pdims[i + 1]), compute_dtype)
        bp = bp.at[:, : b.shape[1]].set(b.astype(compute_dtype))
        w_pad.append(wp)
        b_pad.append(bp)
    return tuple(w_pad), tuple(b_pad), dims


@functools.partial(
    jax.jit,
    static_argnames=("backcast_size", "forecast_size", "true_dims", "tile_b",
                     "num_tensorcores"),
)
def nbeats_block_forward(
    x,
    w_pad,
    b_pad,
    *,
    backcast_size,
    forecast_size,
    true_dims=None,
    tile_b=None,
    num_tensorcores=None,
):
    """Block forward pass with a single fused pallas_call.

    x:      [B, backcast_size] f32 (unpadded; cast to the weight dtype in-kernel)
    w_pad / b_pad: output of prepare_block_params (lane-dense padded params)
    Returns (forecast [B, forecast_size], backcast [B, backcast_size]) in f32.
    """
    B = x.shape[0]
    num_layers = len(w_pad)
    theta_size = backcast_size + forecast_size
    cdt = w_pad[0].dtype
    pdims = [w_pad[0].shape[0]] + [w.shape[1] for w in w_pad]
    assert pdims[0] == backcast_size == x.shape[1]

    # --- batch tiling --------------------------------------------------------
    sublane = 8 * (4 // jnp.dtype(cdt).itemsize)      # 8 rows f32, 16 rows bf16
    if num_tensorcores is None:
        num_tensorcores = _num_tensorcores()
    if tile_b is None:
        tile_b, grid, B_pad = _choose_batch_tiling(
            B, sublane=sublane, num_tc=num_tensorcores)
    else:
        tile_b = _round_up(tile_b, sublane)
        grid = pl.cdiv(B, tile_b)
        B_pad = tile_b * grid

    # Batch-row-only padding (no feature padding of x at all).
    x_in = x if B_pad == B else jnp.pad(x, ((0, B_pad - B), (0, 0)))

    # --- specs ---------------------------------------------------------------
    # x tiled over batch; weights/biases whole-array VMEM-resident (DMA'd once,
    # single-buffered — grid-invariant so no double-buffer duplication).
    in_specs = [pl.BlockSpec((tile_b, pdims[0]), lambda i: (i, 0))]
    param_spec = pl.BlockSpec(memory_space=pltpu.MemorySpace.VMEM)
    params_flat = []
    for wp, bp in zip(w_pad, b_pad):
        in_specs += [param_spec, param_spec]
        params_flat += [wp, bp]

    out_specs = pl.BlockSpec((tile_b, pdims[-1]), lambda i: (i, 0))
    # theta emitted in the compute dtype (bf16 on the bf16 path -> half the
    # writeback HBM traffic); cast back to f32 in the wrapper slice.
    out_shape = jax.ShapeDtypeStruct((B_pad, pdims[-1]), cdt)

    # --- advisory cost estimate on USEFUL (unpadded) work --------------------
    dims = tuple(true_dims) if true_dims is not None else tuple(pdims)
    itemsize = jnp.dtype(cdt).itemsize
    flops = 2 * B * sum(dims[i] * dims[i + 1] for i in range(num_layers))
    bytes_accessed = (
        x.size * x.dtype.itemsize
        + sum(int(a.size) * a.dtype.itemsize for a in params_flat)
        + B * theta_size * itemsize
    )

    theta_pad = pl.pallas_call(
        _make_block_kernel(num_layers),
        out_shape=out_shape,
        grid=(grid,),
        in_specs=in_specs,
        out_specs=out_specs,
        compiler_params=pltpu.CompilerParams(
            dimension_semantics=("parallel",),
        ),
        cost_estimate=pl.CostEstimate(
            flops=int(flops), transcendentals=0, bytes_accessed=int(bytes_accessed)
        ),
    )(x_in, *params_flat)

    # Un-pad + generic-basis split (cheap XLA slices, fused under jit).
    theta = theta_pad[:B, :theta_size].astype(jnp.float32)
    backcast = theta[:, :backcast_size]
    forecast = theta[:, backcast_size:]
    # TODO(synk): fuse the surrounding N-BEATS stack's (x - backcast) residual
    # and forecast accumulation into this kernel / jit to avoid an extra HBM
    # round-trip per block.
    return forecast, backcast


def _init_params(key, backcast_size, forecast_size, mlpes):
    """Deterministic parameter init matching the torch module's layer shapes."""
    dims = [backcast_size] + list(mlpes) + [backcast_size + forecast_size]
    weights, biases = [], []
    for i in range(len(dims) - 1):
        key, kw, kb = jax.random.split(key, 3)
        bound = 1.0 / jnp.sqrt(dims[i])
        # torch Linear.weight is [out, in]; store transposed [in, out] for the kernel.
        w = jax.random.uniform(kw, (dims[i], dims[i + 1]), jnp.float32, -bound, bound)
        b = jax.random.uniform(kb, (1, dims[i + 1]), jnp.float32, -bound, bound)
        weights.append(w)
        biases.append(b)
    return weights, biases


def _reference_forward(x, weights, biases, backcast_size):
    h = x
    for i, (w, b) in enumerate(zip(weights, biases)):
        h = h @ w + b
        if i < len(weights) - 1:
            h = jnp.maximum(h, 0.0)
    return h[:, backcast_size:], h[:, :backcast_size]


if __name__ == "__main__":
    # Small shapes implied by the module: x is [batch, backcast_size].
    batch = 16
    backcast_size = 32
    forecast_size = 16
    mlpes = [64, 64]          # two hidden layers, activation="ReLU"

    key = jax.random.PRNGKey(0)
    key, kx = jax.random.split(key)
    x = jax.random.normal(kx, (batch, backcast_size), jnp.float32)
    weights, biases = _init_params(key, backcast_size, forecast_size, mlpes)
    ref_fc, ref_bc = _reference_forward(x, weights, biases, backcast_size)

    # f32 path ---------------------------------------------------------------
    w_pad, b_pad, dims = prepare_block_params(weights, biases, jnp.float32)
    forecast, backcast = nbeats_block_forward(
        x, w_pad, b_pad,
        backcast_size=backcast_size, forecast_size=forecast_size, true_dims=dims,
    )
    jax.block_until_ready((forecast, backcast))

    assert forecast.shape == (batch, forecast_size)
    assert backcast.shape == (batch, backcast_size)
    assert jnp.allclose(forecast, ref_fc, atol=1e-5, rtol=1e-5)
    assert jnp.allclose(backcast, ref_bc, atol=1e-5, rtol=1e-5)

    # bf16-operand path (v6e/v7x MXU lever; f32 accumulation, bf16 elementwise
    # and bf16 theta writeback) — looser tolerance due to operand quantization.
    w16, b16, dims16 = prepare_block_params(weights, biases, jnp.bfloat16)
    fc16, bc16 = nbeats_block_forward(
        x, w16, b16,
        backcast_size=backcast_size, forecast_size=forecast_size, true_dims=dims16,
    )
    jax.block_until_ready((fc16, bc16))
    assert jnp.allclose(fc16, ref_fc, atol=1e-1, rtol=1e-1)
    assert jnp.allclose(bc16, ref_bc, atol=1e-1, rtol=1e-1)

    print("KERNEL_OK")
</pallas_src>

<mosaic_0001>
module attributes {stable_mosaic.version = 11 : i64} {
  func.func @kernel(%arg0: i32, %arg1: memref<16x32xf32, #tpu.memory_space<vmem>>, %arg2: memref<32x128xf32, #tpu.memory_space<vmem>>, %arg3: memref<1x128xf32, #tpu.memory_space<vmem>>, %arg4: memref<128x128xf32, #tpu.memory_space<vmem>>, %arg5: memref<1x128xf32, #tpu.memory_space<vmem>>, %arg6: memref<128x128xf32, #tpu.memory_space<vmem>>, %arg7: memref<1x128xf32, #tpu.memory_space<vmem>>, %arg8: memref<16x128xf32, #tpu.memory_space<vmem>>) attributes {dimension_semantics = [#tpu.dimension_semantics<parallel>], iteration_bounds = array<i64: 1>, scalar_prefetch = 0 : i64, scratch_operands = 0 : i64, tpu.core_type = #tpu.core_type<tc>, window_params = [{transform_indices = @transform_0, window_bounds = array<i64: 16, 32>}, {pipeline_mode = #tpu.pipeline_mode<synchronous>, transform_indices = @transform_1, window_bounds = array<i64: 32, 128>}, {pipeline_mode = #tpu.pipeline_mode<synchronous>, transform_indices = @transform_2, window_bounds = array<i64: 1, 128>}, {pipeline_mode = #tpu.pipeline_mode<synchronous>, transform_indices = @transform_3, window_bounds = array<i64: 128, 128>}, {pipeline_mode = #tpu.pipeline_mode<synchronous>, transform_indices = @transform_4, window_bounds = array<i64: 1, 128>}, {pipeline_mode = #tpu.pipeline_mode<synchronous>, transform_indices = @transform_5, window_bounds = array<i64: 128, 128>}, {pipeline_mode = #tpu.pipeline_mode<synchronous>, transform_indices = @transform_6, window_bounds = array<i64: 1, 128>}, {transform_indices = @transform_7, window_bounds = array<i64: 16, 128>}]} {
    %c0 = arith.constant 0 : index
    %c0_0 = arith.constant 0 : index
    %0 = vector.load %arg1[%c0, %c0_0] : memref<16x32xf32, #tpu.memory_space<vmem>>, vector<16x32xf32>
    %c0_1 = arith.constant 0 : index
    %c0_2 = arith.constant 0 : index
    %1 = vector.load %arg2[%c0_1, %c0_2] : memref<32x128xf32, #tpu.memory_space<vmem>>, vector<32x128xf32>
    %c0_3 = arith.constant 0 : index
    %c0_4 = arith.constant 0 : index
    %2 = vector.load %arg3[%c0_3, %c0_4] : memref<1x128xf32, #tpu.memory_space<vmem>>, vector<1x128xf32>
    %cst = arith.constant dense<0.000000e+00> : vector<16x128xf32>
    %3 = tpu.matmul %0, %1, %cst {dimension_numbers = #tpu.dot_dimension_numbers<[1], [0], [0], [1], [0, 0, 1, 1], [], []>} : vector<16x32xf32>, vector<32x128xf32>, vector<16x128xf32> -> vector<16x128xf32>
    %4 = vector.broadcast %2 : vector<1x128xf32> to vector<16x128xf32>
    %5 = arith.addf %3, %4 : vector<16x128xf32>
    %cst_5 = arith.constant 0.000000e+00 : f32
    %6 = vector.broadcast %cst_5 : f32 to vector<16x128xf32>
    %7 = arith.maximumf %5, %6 : vector<16x128xf32>
    %c0_6 = arith.constant 0 : index
    %c0_7 = arith.constant 0 : index
    %8 = vector.load %arg4[%c0_6, %c0_7] : memref<128x128xf32, #tpu.memory_space<vmem>>, vector<128x128xf32>
    %c0_8 = arith.constant 0 : index
    %c0_9 = arith.constant 0 : index
    %9 = vector.load %arg5[%c0_8, %c0_9] : memref<1x128xf32, #tpu.memory_space<vmem>>, vector<1x128xf32>
    %cst_10 = arith.constant dense<0.000000e+00> : vector<16x128xf32>
    %10 = tpu.matmul %7, %8, %cst_10 {dimension_numbers = #tpu.dot_dimension_numbers<[1], [0], [0], [1], [0, 0, 1, 1], [], []>} : vector<16x128xf32>, vector<128x128xf32>, vector<16x128xf32> -> vector<16x128xf32>
    %11 = vector.broadcast %9 : vector<1x128xf32> to vector<16x128xf32>
    %12 = arith.addf %10, %11 : vector<16x128xf32>
    %cst_11 = arith.constant 0.000000e+00 : f32
    %13 = vector.broadcast %cst_11 : f32 to vector<16x128xf32>
    %14 = arith.maximumf %12, %13 : vector<16x128xf32>
    %c0_12 = arith.constant 0 : index
    %c0_13 = arith.constant 0 : index
    %15 = vector.load %arg6[%c0_12, %c0_13] : memref<128x128xf32, #tpu.memory_space<vmem>>, vector<128x128xf32>
    %c0_14 = arith.constant 0 : index
    %c0_15 = arith.constant 0 : index
    %16 = vector.load %arg7[%c0_14, %c0_15] : memref<1x128xf32, #tpu.memory_space<vmem>>, vector<1x128xf32>
    %cst_16 = arith.constant dense<0.000000e+00> : vector<16x128xf32>
    %17 = tpu.matmul %14, %15, %cst_16 {dimension_numbers = #tpu.dot_dimension_numbers<[1], [0], [0], [1], [0, 0, 1, 1], [], []>} : vector<16x128xf32>, vector<128x128xf32>, vector<16x128xf32> -> vector<16x128xf32>
    %18 = vector.broadcast %16 : vector<1x128xf32> to vector<16x128xf32>
    %19 = arith.addf %17, %18 : vector<16x128xf32>
    %c0_17 = arith.constant 0 : index
    %c0_18 = arith.constant 0 : index
    %20 = vector.load %arg8[%c0_17, %c0_18] : memref<16x128xf32, #tpu.memory_space<vmem>>, vector<16x128xf32>
    tpu.vector_store %arg8[%c0_17, %c0_18], %19 {strides = array<i32>} : memref<16x128xf32, #tpu.memory_space<vmem>>, vector<16x128xf32>,
    return
  }
  func.func @transform_0(%arg0: i32) -> (i32, i32) {
    %c0_i32 = arith.constant 0 : i32
    %c0_i32_0 = arith.constant 0 : i32
    return %arg0, %c0_i32 : i32, i32
  }
  func.func @transform_1(%arg0: i32) -> (i32, i32) {
    %c0_i32 = arith.constant 0 : i32
    %c0_i32_0 = arith.constant 0 : i32
    %c0_i32_1 = arith.constant 0 : i32
    return %c0_i32, %c0_i32_0 : i32, i32
  }
  func.func @transform_2(%arg0: i32) -> (i32, i32) {
    %c0_i32 = arith.constant 0 : i32
    %c0_i32_0 = arith.constant 0 : i32
    %c0_i32_1 = arith.constant 0 : i32
    return %c0_i32, %c0_i32_0 : i32, i32
  }
  func.func @transform_3(%arg0: i32) -> (i32, i32) {
    %c0_i32 = arith.constant 0 : i32
    %c0_i32_0 = arith.constant 0 : i32
    %c0_i32_1 = arith.constant 0 : i32
    return %c0_i32, %c0_i32_0 : i32, i32
  }
  func.func @transform_4(%arg0: i32) -> (i32, i32) {
    %c0_i32 = arith.constant 0 : i32
    %c0_i32_0 = arith.constant 0 : i32
    %c0_i32_1 = arith.constant 0 : i32
    return %c0_i32, %c0_i32_0 : i32, i32
  }
  func.func @transform_5(%arg0: i32) -> (i32, i32) {
    %c0_i32 = arith.constant 0 : i32
    %c0_i32_0 = arith.constant 0 : i32
    %c0_i32_1 = arith.constant 0 : i32
    return %c0_i32, %c0_i32_0 : i32, i32
  }
  func.func @transform_6(%arg0: i32) -> (i32, i32) {
    %c0_i32 = arith.constant 0 : i32
    %c0_i32_0 = arith.constant 0 : i32
    %c0_i32_1 = arith.constant 0 : i32
    return %c0_i32, %c0_i32_0 : i32, i32
  }
  func.func @transform_7(%arg0: i32) -> (i32, i32) {
    %c0_i32 = arith.constant 0 : i32
    %c0_i32_0 = arith.constant 0 : i32
    return %arg0, %c0_i32 : i32, i32
  }
}

</mosaic_0001>

<bundles_post_ra>
// kernel: nbeats_block_forward.1
= control target key start
LH: loop header
LB: loop body
LE: loop exit
PB: predicated region body
PF: predicated region fallthrough
CT: control target
= control target key end

     0   :  { %12 = vsyncpa [#allocation3], 0  ;;  %s822_s0 = inlined_call_operand.hbm [shape: f32[16,32], index: 0, kind: input, shape index: {}]   ;;  %s823_s1 = inlined_call_operand.hbm [shape: f32[32,128], index: 1, kind: input, shape index: {}]   ;;  %s824_s2 = inlined_call_operand.vmem [shape: f32[1,128], index: 2, kind: input, shape index: {}]   ;;  %s825_s3 = inlined_call_operand.hbm [shape: f32[128,128], index: 3, kind: input, shape index: {}]   ;;  %s826_s4 = inlined_call_operand.vmem [shape: f32[1,128], index: 4, kind: input, shape index: {}]   ;;  %s827_s5 = inlined_call_operand.hbm [shape: f32[128,128], index: 5, kind: input, shape index: {}]   ;;  %s828_s6 = inlined_call_operand.vmem [shape: f32[1,128], index: 6, kind: input, shape index: {}]   ;;  %s829_s7 = inlined_call_operand.vmem [shape: f32[16,128], index: 7, kind: output, shape index: {}]  }
   0x1   :  { %13 = vsyncpa [#allocation5], 0 }
   0x2   :  { %14 = vsyncpa [#allocation8], 0  ;;  %s685_s24 = smov [#allocation4]   ;;  %s686_s26 = smov [#allocation2]  }
   0x3   :  { %s32_s25 = sshll.u32 %s685_s24, 4  ;;  %s20_s27 = sshll.u32 %s686_s26, 4  ;;  %s33_s25 = int_to_ptr.vmem [resolvable:$true] %s32_s25  ;;  %s731_s27 = int_to_ptr.vmem [resolvable:$true] %s20_s27 }
   0x4   :  { %s591_s30 = scalar_lea.hbm %s823_s1, 512 }
   0x5   :  { %p592_p0 = scmp.ne.s32.totalorder %s823_s1, %s591_s30  ;;  %p595_p1 = scmp.lt.u32.totalorder %s591_s30, %s823_s1 }
   0x7   :  { %p597_p2 = pnand %p595_p1, %p592_p0 }
   0x9   :  { %600 = shalt.err (!%p597_p2)
}
   0xa   :  { %s601_s12 = scalar_lea.vmem %s33_s25, 512  ;;  %p606_p4 = scmp.lt.s32.totalorder %s33_s25, %s33_s25 }
   0xb   :  { %p602_p3 = scmp.ne.s32.totalorder %s33_s25, %s601_s12  ;;  %p607_p5 = scmp.lt.s32.totalorder %s601_s12, %s601_s12 }
   0xd   :  { %p608_p6 = por %p607_p5, %p606_p4 }
   0xf   :  { %p609_p7 = pnand %p608_p6, %p602_p3 }
  0x11   :  { %612 = shalt.err (!%p609_p7)
}
  0x12   :  { %s687_s13 = smov 128   ;;  %s688_s14 = smov 8  }
  0x13   :  { %38 = dma.hbm_to_vmem [thread:$0]  %s823_s1, 512, %s33_s25, [#allocation5], %s687_s13, %s687_s13, %s688_s14  }
  0x14   :  { %s613_s19 = scalar_lea.hbm %s822_s0, 256 }
  0x15   :  { %p614_p8 = scmp.ne.s32.totalorder %s822_s0, %s613_s19  ;;  %p617_p9 = scmp.lt.u32.totalorder %s613_s19, %s822_s0 }
  0x17   :  { %p619_p10 = pnand %p617_p9, %p614_p8 }
  0x19   :  { %622 = shalt.err (!%p619_p10)
}
  0x1a   :  { %s623_s24 = scalar_lea.vmem %s731_s27, 256  ;;  %p628_p12 = scmp.lt.s32.totalorder %s731_s27, %s731_s27 }
  0x1b   :  { %p624_p11 = scmp.ne.s32.totalorder %s731_s27, %s623_s24  ;;  %p629_p13 = scmp.lt.s32.totalorder %s623_s24, %s623_s24 }
  0x1d   :  { %p630_p0 = por %p629_p13, %p628_p12 }
  0x1f   :  { %p631_p1 = pnand %p630_p0, %p624_p11 }
  0x21   :  { %634 = shalt.err (!%p631_p1)
}
  0x22   :  { %26 = dma.hbm_to_vmem [thread:$0]  %s822_s0, 256, %s731_s27, [#allocation3], %s687_s13, %s687_s13, %s688_s14  }
  0x23   :  { %s689_s26 = smov [#allocation6]   ;;  %s690_s29 = smov [#allocation7]  }
  0x24   :  { %s46_s28 = sshll.u32 %s689_s26, 4  ;;  %s60_s30 = sshll.u32 %s690_s29, 4  ;;  %s47_s28 = int_to_ptr.vmem [resolvable:$true] %s46_s28  ;;  %s768_s30 = int_to_ptr.vmem [resolvable:$true] %s60_s30 }
  0x25   :  { %s635_s10 = scalar_lea.hbm %s825_s3, 2048 }
  0x26   :  { %p636_p2 = scmp.ne.s32.totalorder %s825_s3, %s635_s10  ;;  %p639_p3 = scmp.lt.u32.totalorder %s635_s10, %s825_s3 }
  0x28   :  { %p641_p4 = pnand %p639_p3, %p636_p2 }
  0x2a   :  { %644 = shalt.err (!%p641_p4)
}
  0x2b   :  { %s645_s0 = scalar_lea.vmem %s47_s28, 2048  ;;  %p650_p6 = scmp.lt.s32.totalorder %s47_s28, %s47_s28 }
  0x2c   :  { %p646_p5 = scmp.ne.s32.totalorder %s47_s28, %s645_s0  ;;  %p651_p7 = scmp.lt.s32.totalorder %s645_s0, %s645_s0 }
  0x2e   :  { %p652_p8 = por %p651_p7, %p650_p6 }
  0x30   :  { %p653_p9 = pnand %p652_p8, %p646_p5 }
  0x32   :  { %656 = shalt.err (!%p653_p9)
}
  0x33   :  { %52 = dma.hbm_to_vmem [thread:$0]  %s825_s3, 2048, %s47_s28, [#allocation5], %s687_s13, %s687_s13, %s688_s14  }
  0x34   :  { %s657_s20 = scalar_lea.hbm %s827_s5, 2048 }
  0x35   :  { %p658_p10 = scmp.ne.s32.totalorder %s827_s5, %s657_s20  ;;  %p661_p11 = scmp.lt.u32.totalorder %s657_s20, %s827_s5 }
  0x37   :  { %p663_p12 = pnand %p661_p11, %p658_p10 }
  0x39   :  { %666 = shalt.err (!%p663_p12)
}
  0x3a   :  { %s667_s1 = scalar_lea.vmem %s768_s30, 2048  ;;  %p672_p0 = scmp.lt.s32.totalorder %s768_s30, %s768_s30 }
  0x3b   :  { %p668_p13 = scmp.ne.s32.totalorder %s768_s30, %s667_s1  ;;  %p673_p1 = scmp.lt.s32.totalorder %s667_s1, %s667_s1 }
  0x3d   :  { %p674_p2 = por %p673_p1, %p672_p0 }
  0x3f   :  { %p675_p3 = pnand %p674_p2, %p668_p13 }
  0x41   :  { %678 = shalt.err (!%p675_p3)
}
  0x42   :  { %66 = dma.hbm_to_vmem [thread:$0]  %s827_s5, 2048, %s768_s30, [#allocation8], %s687_s13, %s687_s13, %s688_s14  }
  0x43   :  { %679 = dma.done.wait [#allocation3], 256  }
  0x44   :  { %680 = vsyncadd [#allocation3], 4294967040 }
  0x45   :  { %681 = dma.done.wait [#allocation5], 2560  }
  0x46   :  { %682 = vsyncadd [#allocation5], 4294964736 }
  0x47   :  { %683 = dma.done.wait [#allocation8], 2048  }
  0x48   :  { %684 = vsyncadd [#allocation8], 4294965248  ;;  %vm94_vm0 = vcmask 261120   ;;  %v83_v0 = vld [vmem:[#allocation4] sm:$0xff]  ;;  %v84_v1 = vld [vmem:[#allocation4 + $0x8] sm:$0xff] }
  0x49   :  { %v85_v2 = vld [vmem:[#allocation4 + $0x10] sm:$0xff]  ;;  %v513_v3 = vpack.c.bf16 %v84_v1, %v83_v0  ;;  %v86_v4 = vld [vmem:[#allocation4 + $0x18] sm:$0xff]  ;;  %v178_v7 = vld [vmem:[#allocation6] sm:$0xff] }
  0x4a   :  { %v81_v5 = vld [vmem:[#allocation2] sm:$0xff]  ;;  %v517_v6 = vpack.c.bf16 %v86_v4, %v85_v2  ;;  %v179_v8 = vld [vmem:[#allocation6 + $0x8] sm:$0xff]  ;;  %v181_v11 = vld [vmem:[#allocation6 + $0x18] sm:$0xff] }
  0x4b   :  { %440 = vmatprep.mubr.msk.f32.mxu0 %vm94_vm0, %v81_v5  ;;  %v180_v9 = vld [vmem:[#allocation6 + $0x10] sm:$0xff]  ;;  %514 = vmatprep.subr.bf16.mxu0 %v513_v3  ;;  %v521_v10 = vpack.c.bf16 %v179_v8, %v178_v7  ;;  %v182_v13 = vld [vmem:[#allocation6 + $0x20] sm:$0xff]  ;;  %v183_v14 = vld [vmem:[#allocation6 + $0x28] sm:$0xff] }
  0x4c   :  { %516 = vmatpush3.bf16.msra.mxu0 %v513_v3  ;;  %v525_v12 = vpack.c.bf16 %v181_v11, %v180_v9  ;;  %v529_v15 = vpack.c.bf16 %v183_v14, %v182_v13  ;;  %v82_v16 = vld [vmem:[#allocation2 + $0x8] sm:$0xff]  ;;  %v184_v17 = vld [vmem:[#allocation6 + $0x30] sm:$0xff]  ;;  %v186_v20 = vld [vmem:[#allocation6 + $0x40] sm:$0xff] }
  0x4d   :  { %518 = vmatprep.subr.bf16.mxu0 %v517_v6  ;;  %522 = vmatprep.subr.bf16.mxu1 %v521_v10  ;;  %v185_v18 = vld [vmem:[#allocation6 + $0x38] sm:$0xff]  ;;  %v187_v21 = vld [vmem:[#allocation6 + $0x48] sm:$0xff]  ;;  %v188_v23 = vld [vmem:[#allocation6 + $0x50] sm:$0xff] }
  0x4e   :  { %524 = vmatpush3.bf16.msra.mxu1 %v521_v10  ;;  %v533_v19 = vpack.c.bf16 %v185_v18, %v184_v17  ;;  %v537_v22 = vpack.c.bf16 %v187_v21, %v186_v20  ;;  %v189_v24 = vld [vmem:[#allocation6 + $0x58] sm:$0xff]  ;;  %v190_v26 = vld [vmem:[#allocation6 + $0x60] sm:$0xff]  ;;  %v191_v27 = vld [vmem:[#allocation6 + $0x68] sm:$0xff] }
  0x4f   :  { %526 = vmatprep.subr.bf16.mxu1 %v525_v12  ;;  %v541_v25 = vpack.c.bf16 %v189_v24, %v188_v23  ;;  %v545_v28 = vpack.c.bf16 %v191_v27, %v190_v26  ;;  %v192_v29 = vld [vmem:[#allocation6 + $0x70] sm:$0xff]  ;;  %v193_v30 = vld [vmem:[#allocation6 + $0x78] sm:$0xff]  ;;  %v278_v32 = vld [vmem:[#allocation7] sm:$0xff] }
  0x50   :  { %520 = vmatpush3.bf16.msra.mxu0 %v517_v6  ;;  %v549_v31 = vpack.c.bf16 %v193_v30, %v192_v29  ;;  %v279_v33 = vld [vmem:[#allocation7 + $0x8] sm:$0xff]  ;;  %v280_v34 = vld [vmem:[#allocation7 + $0x10] sm:$0xff]  ;;  %v281_v36 = vld [vmem:[#allocation7 + $0x18] sm:$0xff] }
  0x51   :  { %v553_v35 = vpack.c.bf16 %v279_v33, %v278_v32  ;;  %v557_v37 = vpack.c.bf16 %v281_v36, %v280_v34  ;;  %v282_v38 = vld [vmem:[#allocation7 + $0x20] sm:$0xff]  ;;  %v283_v39 = vld [vmem:[#allocation7 + $0x28] sm:$0xff]  ;;  %v284_v41 = vld [vmem:[#allocation7 + $0x30] sm:$0xff] }
  0x52   :  { %528 = vmatpush3.bf16.msra.mxu1 %v525_v12  ;;  %v561_v40 = vpack.c.bf16 %v283_v39, %v282_v38  ;;  %v285_v42 = vld [vmem:[#allocation7 + $0x38] sm:$0xff]  ;;  %v286_v44 = vld [vmem:[#allocation7 + $0x40] sm:$0xff]  ;;  %v287_v45 = vld [vmem:[#allocation7 + $0x48] sm:$0xff] }
  0x53   :  { %441 = vmatmul.mubr.msk.f32.vlgmr.msra.gmra.mrb[0].mxu0 %vm94_vm0, %v82_v16  ;;  %530 = vmatprep.subr.bf16.mxu1 %v529_v15  ;;  %v565_v43 = vpack.c.bf16 %v285_v42, %v284_v41  ;;  %v569_v46 = vpack.c.bf16 %v287_v45, %v286_v44  ;;  %v288_v47 = vld [vmem:[#allocation7 + $0x50] sm:$0xff]  ;;  %v289_v48 = vld [vmem:[#allocation7 + $0x58] sm:$0xff]  ;;  %v290_v50 = vld [vmem:[#allocation7 + $0x60] sm:$0xff] }
  0x54   :  { %554 = vmatprep.subr.bf16.mxu0 %v553_v35  ;;  %v573_v49 = vpack.c.bf16 %v289_v48, %v288_v47  ;;  %v291_v51 = vld [vmem:[#allocation7 + $0x68] sm:$0xff]  ;;  %v385_v53 = vld [vmem:[%s824_s2] ss:$0 sm:$0xff]  ;;  %v292_v60 = vld [vmem:[#allocation7 + $0x70] sm:$0xff] }
  0x55   :  { %556 = vmatpush3.bf16.msra.mxu0 %v553_v35  ;;  %v577_v52 = vpack.c.bf16 %v291_v51, %v290_v50  ;;  %v293_v61 = vld [vmem:[#allocation7 + $0x78] sm:$0xff]  ;;  %v388_v63 = vld [vmem:[%s826_s4] ss:$0 sm:$0xff] }
  0x56   :  { %532 = vmatpush3.bf16.msra.mxu1 %v529_v15  ;;  %558 = vmatprep.subr.bf16.mxu0 %v557_v37  ;;  %v581_v62 = vpack.c.bf16 %v293_v61, %v292_v60  ;;  %v389_v6 = vld [vmem:[%s828_s6] ss:$0 sm:$0xff] }
  0x57   :  { %534 = vmatprep.subr.bf16.mxu1 %v533_v19 }
  0x59   :  { %560 = vmatpush3.bf16.msra.mxu0 %v557_v37 }
  0x5a   :  { %536 = vmatpush3.bf16.msra.mxu1 %v533_v19  ;;  %562 = vmatprep.subr.bf16.mxu0 %v561_v40 }
  0x5b   :  { %538 = vmatprep.subr.bf16.mxu1 %v537_v22 }
  0x5d   :  { %564 = vmatpush3.bf16.msra.mxu0 %v561_v40 }
  0x5e   :  { %540 = vmatpush3.bf16.msra.mxu1 %v537_v22  ;;  %566 = vmatprep.subr.bf16.mxu0 %v565_v43 }
  0x5f   :  { %542 = vmatprep.subr.bf16.mxu1 %v541_v25 }
  0x61   :  { %568 = vmatpush3.bf16.msra.mxu0 %v565_v43 }
  0x62   :  { %544 = vmatpush3.bf16.msra.mxu1 %v541_v25  ;;  %570 = vmatprep.subr.bf16.mxu0 %v569_v46 }
  0x63   :  { %546 = vmatprep.subr.bf16.mxu1 %v545_v28 }
  0x65   :  { %572 = vmatpush3.bf16.msra.mxu0 %v569_v46 }
  0x66   :  { %548 = vmatpush3.bf16.msra.mxu1 %v545_v28  ;;  %574 = vmatprep.subr.bf16.mxu0 %v573_v49 }
  0x67   :  { %550 = vmatprep.subr.bf16.mxu1 %v549_v31 }
  0x69   :  { %576 = vmatpush3.bf16.msra.mxu0 %v573_v49 }
  0x6a   :  { %552 = vmatpush3.bf16.msra.mxu1 %v549_v31  ;;  %578 = vmatprep.subr.bf16.mxu0 %v577_v52 }
  0x6d   :  { %580 = vmatpush3.bf16.msra.mxu0 %v577_v52 }
  0x6e   :  { %582 = vmatprep.subr.bf16.mxu0 %v581_v62 }
  0x71   :  { %584 = vmatpush3.bf16.msra.mxu0 %v581_v62 }
 0x126   :  { %v442_v54 = vpop.f32.mrb[0].mxu0 }
 0x127   :  { %v173_v55 = vadd.f32 %v442_v54, %v385_v53  ;;  %v167_v56 = vpop.f32.mrb[1].mxu0 }
 0x128   :  { %v168_v57 = vadd.f32 %v385_v53, %v167_v56 }
 0x129   :  { %v177_v59 = vmax.f32 %v173_v55, 0.0 }
 0x12a   :  { %v176_v58 = vmax.f32 %v168_v57, 0.0 }
 0x12c   :  { %475 = vmatprep.mubr.f32.mxu1 %v176_v58 }
 0x12d   :  { %476 = vmatmul.mubr.f32.vlgmr.msra.gmra.mrb[0].mxu1 %v177_v59 }
 0x200   :  { %v477_v0 = vpop.f32.mrb[0].mxu1 }
 0x201   :  { %v273_v1 = vadd.f32 %v477_v0, %v388_v63  ;;  %v267_v2 = vpop.f32.mrb[1].mxu1 }
 0x202   :  { %v268_v3 = vadd.f32 %v388_v63, %v267_v2 }
 0x203   :  { %v277_v5 = vmax.f32 %v273_v1, 0.0 }
 0x204   :  { %v276_v4 = vmax.f32 %v268_v3, 0.0 }
 0x206   :  { %510 = vmatprep.mubr.f32.mxu0 %v276_v4 }
 0x207   :  { %511 = vmatmul.mubr.f32.vlgmr.msra.gmra.mrb[2].mxu0 %v277_v5 }
 0x2da   :  { %v512_v7 = vpop.f32.mrb[2].mxu0 }
 0x2db   :  { %v373_v8 = vadd.f32 %v512_v7, %v389_v6  ;;  %v367_v9 = vpop.f32.mrb[3].mxu0 }
 0x2dc   :  { %v368_v10 = vadd.f32 %v389_v6, %v367_v9 }
 0x2dd   :  { %377 = vst [vmem:[%s829_s7 + $0x8] sm:$0xff] %v373_v8 }
 0x2de   :  { %376 = vst [vmem:[%s829_s7] sm:$0xff] %v368_v10 }
 0x2df   :  { %382 = vsyncpa [#allocation3], 1 }
 0x2e0   :  { %383 = vsyncpa [#allocation5], 1 }
 0x2e1   :  { %384 = vsyncpa [#allocation8], 1 }

</bundles_post_ra>
